<compile_context>
chip_gen: v7x
topology: tpu7x:2x2x1
jax: 0.10.0
libtpu: 0.0.40
codegen_flags: <defaults>
</compile_context>

<pallas_src>
import functools

import jax
import jax.numpy as jnp
from jax.experimental import pallas as pl
from jax.experimental.pallas import tpu as pltpu

NUM_CLASSES = 10


def _arccos(x):
    # Exact identity for |x| < 1 (guaranteed by the clip):
    #   acos(x) = 2 * atan2(sqrt(1 - x), sqrt(1 + x))
    return 2.0 * jnp.arctan2(jnp.sqrt(1.0 - x), jnp.sqrt(1.0 + x))


def ang_kernel(cos_ref, lab_ref, params_ref, out_ref, acc_ref, *, n, tn):
    i = pl.program_id(0)
    last = pl.num_programs(0) - 1

    @pl.when(i == 0)
    def _():
        acc_ref[0] = 0.0
        acc_ref[1] = 0.0

    cm = params_ref[0]
    s = params_ref[1]

    # (C, TN) tile: classes on sublanes, batch on lanes. Cast in-kernel so
    # the HBM stream stays in the caller's dtype.
    cos = cos_ref[...].astype(jnp.float32)
    labels = lab_ref[...]                                    # (1, TN) int32

    cos = jnp.clip(cos, -1.0 + 1e-7, 1.0 - 1e-7)

    c = cos.shape[0]
    row = jax.lax.broadcasted_iota(jnp.int32, (c, tn), 0)
    onehot = (row == labels).astype(jnp.float32)             # (C, TN)

    # margin + scale
    logits = (cos - onehot * cm) * s                         # (C, TN)

    # numerically stable log-sum-exp over the class (sublane) axis (XLU reduce)
    m = jnp.max(logits, axis=0, keepdims=True)               # (1, TN)
    lse = jnp.log(jnp.sum(jnp.exp(logits - m), axis=0, keepdims=True)) + m

    # gather the labeled cosine; transcendental work only on the (1, TN) row
    cos_y = jnp.sum(cos * onehot, axis=0, keepdims=True)     # (1, TN)
    logit_y = (cos_y - cm) * s                               # == sum(logits*onehot)
    theta_y = _arccos(cos_y)

    # mask out padded columns of the ragged last tile
    col = i * tn + jax.lax.broadcasted_iota(jnp.int32, (1, tn), 1)
    valid = col < n
    ce = jnp.where(valid, lse - logit_y, 0.0)
    sq = jnp.where(valid, theta_y * theta_y, 0.0)

    acc_ref[0] += jnp.sum(ce)
    acc_ref[1] += jnp.sum(sq)

    @pl.when(i == last)
    def _():
        inv_n = jnp.float32(1.0 / n)                          # n is static
        out_ref[0, 0] = acc_ref[0] * inv_n + 0.55 * (acc_ref[1] * inv_n)


def ang_loss(cosin_theta, labels, s=30.0, cm=0.0, tn=8192):
    """Pallas implementation of Ang.forward(cosin_theta, labels, cm)."""
    n, c = cosin_theta.shape
    assert c == NUM_CLASSES

    # Lane-dense layout: classes -> sublanes, batch -> lanes.
    cos_t = jnp.transpose(cosin_theta)                        # (C, N), input dtype
    lab2d = labels.astype(jnp.int32).reshape(1, n)
    params = jnp.asarray([cm, s], dtype=jnp.float32)

    # Tile width: multiple of 128 lanes; don't exceed the (lane-padded) batch.
    n_padded = pl.cdiv(n, 128) * 128
    tn = pl.cdiv(int(tn), 128) * 128
    tn = max(128, min(tn, n_padded))
    grid = (pl.cdiv(n, tn),)

    kernel = functools.partial(ang_kernel, n=n, tn=tn)

    out = pl.pallas_call(
        kernel,
        out_shape=jax.ShapeDtypeStruct((1, 1), jnp.float32),
        grid=grid,
        in_specs=[
            pl.BlockSpec((NUM_CLASSES, tn), lambda i: (0, i)),   # cos (C, N)
            pl.BlockSpec((1, tn), lambda i: (0, i)),             # labels (1, N)
            pl.BlockSpec(memory_space=pltpu.MemorySpace.SMEM),   # [cm, s]
        ],
        out_specs=pl.BlockSpec(memory_space=pltpu.MemorySpace.SMEM),
        scratch_shapes=[pltpu.SMEM((2,), jnp.float32)],          # [sum_ce, sum_sq]
        compiler_params=pltpu.CompilerParams(
            dimension_semantics=("arbitrary",)),
    )(cos_t, lab2d, params)
    return out[0, 0]


def _ang_loss_ref(cosin_theta, labels, s, cm):
    # pure-JAX reference for validation
    cos = jnp.clip(cosin_theta.astype(jnp.float32), -1.0 + 1e-7, 1.0 - 1e-7)
    theta = jnp.arccos(cos)
    onehot = jax.nn.one_hot(labels, NUM_CLASSES, dtype=jnp.float32)
    logits = (cos - onehot * cm) * s
    logp = jax.nn.log_softmax(logits, axis=-1)
    loss_ce = -jnp.mean(jnp.sum(logp * onehot, axis=-1))
    theta_y = jnp.take_along_axis(theta, labels[:, None], axis=1)
    loss_wfc = jnp.mean(theta_y ** 2)
    return loss_ce + 0.55 * loss_wfc


if __name__ == "__main__":
    key = jax.random.PRNGKey(0)
    k1, k2, k3, k4 = jax.random.split(key, 4)

    S_PARAM = 30.0   # module's `s` (None in __init__; set here)
    CM = 0.2         # forward-call margin argument

    # --- small shape: single (padded/masked) tile ---
    batch = 8
    cosin_theta = jax.random.uniform(
        k1, (batch, NUM_CLASSES), dtype=jnp.float32, minval=-1.0, maxval=1.0)
    labels = jax.random.randint(k2, (batch,), 0, NUM_CLASSES, dtype=jnp.int32)

    loss = ang_loss(cosin_theta, labels, s=S_PARAM, cm=CM)
    loss = jax.block_until_ready(loss)
    ref = _ang_loss_ref(cosin_theta, labels, S_PARAM, CM)
    assert jnp.allclose(loss, ref, rtol=2e-3, atol=2e-3), (loss, ref)

    # --- multi-tile + ragged last tile: exercises grid accumulation/masking ---
    batch2 = 1000
    ct2 = jax.random.uniform(
        k3, (batch2, NUM_CLASSES), dtype=jnp.float32, minval=-1.0, maxval=1.0)
    lb2 = jax.random.randint(k4, (batch2,), 0, NUM_CLASSES, dtype=jnp.int32)

    loss2 = ang_loss(ct2, lb2, s=S_PARAM, cm=CM, tn=256)
    loss2 = jax.block_until_ready(loss2)
    ref2 = _ang_loss_ref(ct2, lb2, S_PARAM, CM)
    assert jnp.allclose(loss2, ref2, rtol=2e-3, atol=2e-3), (loss2, ref2)

    print("KERNEL_OK")
</pallas_src>

<mosaic_0001>
module attributes {stable_mosaic.version = 11 : i64} {
  func.func @ang_kernel(%arg0: i32, %arg1: memref<10x128xf32, #tpu.memory_space<vmem>>, %arg2: memref<1x128xi32, #tpu.memory_space<vmem>>, %arg3: memref<2xf32, #tpu.memory_space<smem>>, %arg4: memref<1x1xf32, #tpu.memory_space<smem>>, %arg5: memref<2xf32, #tpu.memory_space<smem>>) attributes {dimension_semantics = [#tpu.dimension_semantics<arbitrary>], iteration_bounds = array<i64: 1>, scalar_prefetch = 0 : i64, scratch_operands = 1 : i64, tpu.core_type = #tpu.core_type<tc>, window_params = [{transform_indices = @transform_0, window_bounds = array<i64: 10, 128>}, {transform_indices = @transform_1, window_bounds = array<i64: 1, 128>}, {transform_indices = @transform_2, window_bounds = array<i64: 2>}, {transform_indices = @transform_3, window_bounds = array<i64: 1, 1>}]} {
    %c0_i32 = arith.constant 0 : i32
    %0 = arith.cmpi eq, %arg0, %c0_i32 : i32
    %1 = arith.extui %0 : i1 to i32
    %c0_i32_0 = arith.constant 0 : i32
    %2 = arith.cmpi ne, %1, %c0_i32_0 : i32
    scf.if %2 {
      %cst_22 = arith.constant 0.000000e+00 : f32
      %c0_23 = arith.constant 0 : index
      %75 = memref.load %arg5[%c0_23] : memref<2xf32, #tpu.memory_space<smem>>
      memref.store %cst_22, %arg5[%c0_23] : memref<2xf32, #tpu.memory_space<smem>>
      %cst_24 = arith.constant 0.000000e+00 : f32
      %c1_25 = arith.constant 1 : index
      %76 = memref.load %arg5[%c1_25] : memref<2xf32, #tpu.memory_space<smem>>
      memref.store %cst_24, %arg5[%c1_25] : memref<2xf32, #tpu.memory_space<smem>>
    } else {
    }
    %c0 = arith.constant 0 : index
    %3 = memref.load %arg3[%c0] : memref<2xf32, #tpu.memory_space<smem>>
    %c1 = arith.constant 1 : index
    %4 = memref.load %arg3[%c1] : memref<2xf32, #tpu.memory_space<smem>>
    %c0_1 = arith.constant 0 : index
    %c0_2 = arith.constant 0 : index
    %5 = vector.load %arg1[%c0_1, %c0_2] : memref<10x128xf32, #tpu.memory_space<vmem>>, vector<10x128xf32>
    %c0_3 = arith.constant 0 : index
    %c0_4 = arith.constant 0 : index
    %6 = vector.load %arg2[%c0_3, %c0_4] : memref<1x128xi32, #tpu.memory_space<vmem>>, vector<1x128xi32>
    %cst = arith.constant -0.99999988 : f32
    %cst_5 = arith.constant 0.99999988 : f32
    %7 = vector.broadcast %cst : f32 to vector<10x128xf32>
    %8 = arith.maximumf %7, %5 : vector<10x128xf32>
    %9 = vector.broadcast %cst_5 : f32 to vector<10x128xf32>
    %10 = arith.minimumf %9, %8 : vector<10x128xf32>
    %11 = tpu.iota {dimensions = array<i32: 0>} : vector<10x128xi32>
    %12 = vector.broadcast %6 : vector<1x128xi32> to vector<10x128xi32>
    %13 = arith.cmpi eq, %11, %12 : vector<10x128xi32>
    %14 = arith.extui %13 : vector<10x128xi1> to vector<10x128xi32>
    %15 = arith.sitofp %14 : vector<10x128xi32> to vector<10x128xf32>
    %16 = vector.broadcast %3 : f32 to vector<10x128xf32>
    %17 = arith.mulf %15, %16 : vector<10x128xf32>
    %18 = arith.subf %10, %17 : vector<10x128xf32>
    %19 = vector.broadcast %4 : f32 to vector<10x128xf32>
    %20 = arith.mulf %18, %19 : vector<10x128xf32>
    %cst_6 = arith.constant dense<0xFF800000> : vector<128xf32>
    %21 = vector.multi_reduction <maximumf>, %20, %cst_6 [0] : vector<10x128xf32> to vector<128xf32>
    %22 = vector.shape_cast %21 : vector<128xf32> to vector<1x128xf32>
    %23 = vector.broadcast %22 : vector<1x128xf32> to vector<10x128xf32>
    %24 = arith.subf %20, %23 : vector<10x128xf32>
    %25 = math.exp %24 : vector<10x128xf32>
    %cst_7 = arith.constant dense<0.000000e+00> : vector<128xf32>
    %26 = vector.multi_reduction <add>, %25, %cst_7 [0] : vector<10x128xf32> to vector<128xf32>
    %27 = vector.shape_cast %26 : vector<128xf32> to vector<1x128xf32>
    %28 = math.log %27 : vector<1x128xf32>
    %29 = arith.addf %28, %22 : vector<1x128xf32>
    %30 = arith.mulf %10, %15 : vector<10x128xf32>
    %cst_8 = arith.constant dense<0.000000e+00> : vector<128xf32>
    %31 = vector.multi_reduction <add>, %30, %cst_8 [0] : vector<10x128xf32> to vector<128xf32>
    %32 = vector.shape_cast %31 : vector<128xf32> to vector<1x128xf32>
    %33 = vector.broadcast %3 : f32 to vector<1x128xf32>
    %34 = arith.subf %32, %33 : vector<1x128xf32>
    %35 = vector.broadcast %4 : f32 to vector<1x128xf32>
    %36 = arith.mulf %34, %35 : vector<1x128xf32>
    %cst_9 = arith.constant 1.000000e+00 : f32
    %37 = vector.broadcast %cst_9 : f32 to vector<1x128xf32>
    %38 = arith.subf %37, %32 : vector<1x128xf32>
    %39 = math.sqrt %38 : vector<1x128xf32>
    %cst_10 = arith.constant 1.000000e+00 : f32
    %40 = vector.broadcast %cst_10 : f32 to vector<1x128xf32>
    %41 = arith.addf %40, %32 : vector<1x128xf32>
    %42 = math.sqrt %41 : vector<1x128xf32>
    %43 = math.atan2 %39, %42 : vector<1x128xf32>
    %cst_11 = arith.constant 2.000000e+00 : f32
    %44 = vector.broadcast %cst_11 : f32 to vector<1x128xf32>
    %45 = arith.mulf %44, %43 : vector<1x128xf32>
    %c128_i32 = arith.constant 128 : i32
    %46 = arith.muli %arg0, %c128_i32 : i32
    %47 = tpu.iota {dimensions = array<i32: 1>} : vector<1x128xi32>
    %48 = vector.broadcast %46 : i32 to vector<1x128xi32>
    %49 = arith.addi %48, %47 : vector<1x128xi32>
    %c8_i32 = arith.constant 8 : i32
    %50 = vector.broadcast %c8_i32 : i32 to vector<1x128xi32>
    %51 = arith.cmpi slt, %49, %50 : vector<1x128xi32>
    %52 = arith.subf %29, %36 : vector<1x128xf32>
    %cst_12 = arith.constant 0.000000e+00 : f32
    %53 = vector.broadcast %cst_12 : f32 to vector<1x128xf32>
    %54 = arith.select %51, %52, %53 : vector<1x128xi1>, vector<1x128xf32>
    %55 = arith.mulf %45, %45 : vector<1x128xf32>
    %cst_13 = arith.constant 0.000000e+00 : f32
    %56 = vector.broadcast %cst_13 : f32 to vector<1x128xf32>
    %57 = arith.select %51, %55, %56 : vector<1x128xi1>, vector<1x128xf32>
    %c0_14 = arith.constant 0 : index
    %58 = memref.load %arg5[%c0_14] : memref<2xf32, #tpu.memory_space<smem>>
    %59 = vector.shape_cast %54 : vector<1x128xf32> to vector<1x1x128xf32>
    %cst_15 = arith.constant dense<0.000000e+00> : vector<1xf32>
    %60 = vector.multi_reduction <add>, %59, %cst_15 [1, 2] : vector<1x1x128xf32> to vector<1xf32>
    %61 = vector.shape_cast %60 : vector<1xf32> to vector<1x1x1xf32>
    %62 = vector.extract %61[0, 0, 0] : f32 from vector<1x1x1xf32>
    %63 = arith.addf %58, %62 : f32
    %c0_16 = arith.constant 0 : index
    %64 = memref.load %arg5[%c0_16] : memref<2xf32, #tpu.memory_space<smem>>
    memref.store %63, %arg5[%c0_16] : memref<2xf32, #tpu.memory_space<smem>>
    %c1_17 = arith.constant 1 : index
    %65 = memref.load %arg5[%c1_17] : memref<2xf32, #tpu.memory_space<smem>>
    %66 = vector.shape_cast %57 : vector<1x128xf32> to vector<1x1x128xf32>
    %cst_18 = arith.constant dense<0.000000e+00> : vector<1xf32>
    %67 = vector.multi_reduction <add>, %66, %cst_18 [1, 2] : vector<1x1x128xf32> to vector<1xf32>
    %68 = vector.shape_cast %67 : vector<1xf32> to vector<1x1x1xf32>
    %69 = vector.extract %68[0, 0, 0] : f32 from vector<1x1x1xf32>
    %70 = arith.addf %65, %69 : f32
    %c1_19 = arith.constant 1 : index
    %71 = memref.load %arg5[%c1_19] : memref<2xf32, #tpu.memory_space<smem>>
    memref.store %70, %arg5[%c1_19] : memref<2xf32, #tpu.memory_space<smem>>
    %c0_i32_20 = arith.constant 0 : i32
    %72 = arith.cmpi eq, %arg0, %c0_i32_20 : i32
    %73 = arith.extui %72 : i1 to i32
    %c0_i32_21 = arith.constant 0 : i32
    %74 = arith.cmpi ne, %73, %c0_i32_21 : i32
    scf.if %74 {
      %c0_22 = arith.constant 0 : index
      %75 = memref.load %arg5[%c0_22] : memref<2xf32, #tpu.memory_space<smem>>
      %cst_23 = arith.constant 1.250000e-01 : f32
      %76 = arith.mulf %75, %cst_23 : f32
      %c1_24 = arith.constant 1 : index
      %77 = memref.load %arg5[%c1_24] : memref<2xf32, #tpu.memory_space<smem>>
      %cst_25 = arith.constant 1.250000e-01 : f32
      %78 = arith.mulf %77, %cst_25 : f32
      %cst_26 = arith.constant 5.500000e-01 : f32
      %79 = arith.mulf %cst_26, %78 : f32
      %80 = arith.addf %76, %79 : f32
      %c0_27 = arith.constant 0 : index
      %c0_28 = arith.constant 0 : index
      %81 = memref.load %arg4[%c0_27, %c0_28] : memref<1x1xf32, #tpu.memory_space<smem>>
      memref.store %80, %arg4[%c0_27, %c0_28] : memref<1x1xf32, #tpu.memory_space<smem>>
    } else {
    }
    return
  }
  func.func @transform_0(%arg0: i32) -> (i32, i32) {
    %c0_i32 = arith.constant 0 : i32
    %c0_i32_0 = arith.constant 0 : i32
    return %c0_i32, %arg0 : i32, i32
  }
  func.func @transform_1(%arg0: i32) -> (i32, i32) {
    %c0_i32 = arith.constant 0 : i32
    %c0_i32_0 = arith.constant 0 : i32
    return %c0_i32, %arg0 : i32, i32
  }
  func.func @transform_2(%arg0: i32) -> i32 {
    %c0_i32 = arith.constant 0 : i32
    %c0_i32_0 = arith.constant 0 : i32
    return %c0_i32 : i32
  }
  func.func @transform_3(%arg0: i32) -> (i32, i32) {
    %c0_i32 = arith.constant 0 : i32
    %c0_i32_0 = arith.constant 0 : i32
    %c0_i32_1 = arith.constant 0 : i32
    return %c0_i32, %c0_i32_0 : i32, i32
  }
}

</mosaic_0001>

<bundles_post_ra>
// kernel: tpu_custom_call.1
= control target key start
LH: loop header
LB: loop body
LE: loop exit
PB: predicated region body
PF: predicated region fallthrough
CT: control target
= control target key end

     0   :  { %8 = vsyncpa [#allocation5], 0  ;;  %s376_s0 = inlined_call_operand.vmem [shape: f32[10,8], index: 0, kind: input, shape index: {}]   ;;  %s377_s1 = inlined_call_operand.vmem [shape: s32[1,8], index: 1, kind: input, shape index: {}]   ;;  %s378_s2 = inlined_call_operand.vmem [shape: f32[2], index: 2, kind: input, shape index: {}]   ;;  %s379_s3 = inlined_call_operand.hbm [shape: f32[1,1], index: 3, kind: output, shape index: {}]  }
   0x1   :  { %9 = vsyncpa [#allocation4], 0  ;;  %s20_s14 = sshll.u32 %s378_s2, 4  ;;  %s21_s14 = int_to_ptr.vmem [resolvable:$true] %s20_s14 }
   0x2   :  { %s260_s15 = scalar_lea.vmem %s21_s14, 16  ;;  %p265_p1 = scmp.lt.s32.totalorder %s21_s14, %s21_s14 }
   0x3   :  { %p261_p0 = scmp.ne.s32.totalorder %s21_s14, %s260_s15  ;;  %p266_p2 = scmp.lt.s32.totalorder %s260_s15, %s260_s15 }
   0x5   :  { %p267_p3 = por %p266_p2, %p265_p1 }
   0x7   :  { %p268_p4 = pnand %p267_p3, %p261_p0 }
   0x9   :  { %271 = shalt.err (!%p268_p4)
}
   0xa   :  { %s286_s16 = smov [#allocation3]  }
   0xb   :  { %23 = dma.vmem_to_smem %s21_s14, 16, %s286_s16, [#allocation5]  }
   0xc   :  { %282 = dma.done.wait [#allocation5], 16  }
   0xd   :  { %283 = vsyncadd [#allocation5], 4294967280 }
   0xe   :  { %27 = sfence }
   0xf   :  { %s36_s17 = sld [smem:[#allocation3]]  ;;  %s232_s18 = sld [smem:[#allocation3 + $0x1]]  ;;  %v38_v0 = vld [vmem:[%s376_s0] sm:$0xff]  ;;  %v45_v1 = vlaneseq  ;;  %v39_v2 = vld [vmem:[%s376_s0 + $0x8] sm:$0x3]  ;;  %v287_v8 = vmov 0.0  }
  0x10   :  { %v235_v3 = vld [vmem:[%s377_s1] ss:$0 sm:$0xff]  ;;  %v233_v5 = vclamps-f32 %v38_v0, 0.9999999  ;;  %v234_v6 = vclamps-f32 %v39_v2, 0.9999999 }
  0x11   :  { %v46_v4 = vshrl.u32 %v45_v1, 7  ;;  %vm66_vm2 = vcmask 1041408   ;;  %vm179_vm8 = vcmask 1040384   ;;  %s272_s30 = scalar_lea.hbm %s379_s3, 16 }
  0x12   :  { %p273_p5 = scmp.ne.s32.totalorder %s379_s3, %s272_s30  ;;  %p276_p6 = scmp.lt.u32.totalorder %s272_s30, %s379_s3 }
  0x13   :  { %v47_v7 = vadd.s32 8, %v46_v4  ;;  %vm52_vm0 = vcmp.eq.s32.totalorder %v46_v4, %v235_v3 }
  0x14   :  { %v236_v9 = vsel %vm52_vm0, 1.0, %v287_v8  ;;  %p278_p7 = pnand %p276_p6, %p273_p5 }
  0x15   :  { %vm53_vm1 = vcmp.eq.s32.totalorder %v47_v7, %v235_v3  ;;  %v324_v10 = vstv %s36_s17  ;;  %v92_v13 = vmul.f32 %v236_v9, %v233_v5  ;;  %v329_v15 = vstv %s232_s18 }
  0x16   :  { %v237_v11 = vsel %vm53_vm1, 1.0, %v287_v8  ;;  %v59_v12 = vmul.f32 %v236_v9, %v324_v10 }
  0x17   :  { %v60_v14 = vmul.f32 %v237_v11, %v324_v10  ;;  %v93_v16 = vmul.f32 %v237_v11, %v234_v6 }
  0x18   :  { %v61_v17 = vsub.f32 %v233_v5, %v59_v12 }
  0x19   :  { %v62_v18 = vsub.f32 %v234_v6, %v60_v14  ;;  %v94_v19 = vsel %vm66_vm2, %v93_v16, 0.0  ;;  %v170_v16 = vand.u32 127, %v45_v1 }
  0x1a   :  { %v64_v20 = vmul.f32 %v329_v15, %v61_v17  ;;  %v95_v21 = vadd.f32 %v94_v19, %v92_v13 }
  0x1b   :  { %v65_v22 = vmul.f32 %v329_v15, %v62_v18  ;;  %vm173_vm7 = vcmp.lt.s32.totalorder %v170_v16, 8 }
  0x1c   :  { %v96_v23 = vrot.slane %v95_v21, 4 }
  0x1d   :  { %v67_v24 = vsel %vm66_vm2, %v65_v22, -inf }
  0x1e   :  { %v68_v25 = vmax.f32 %v64_v20, %v67_v24  ;;  %v97_v26 = vadd.f32 %v96_v23, %v95_v21 }
  0x20   :  { %v69_v27 = vrot.slane %v68_v25, 4  ;;  %v98_v28 = vrot.slane %v97_v26, 2 }
  0x22   :  { %v70_v29 = vmax.f32 %v68_v25, %v69_v27  ;;  %v99_v30 = vadd.f32 %v98_v28, %v97_v26 }
  0x24   :  { %v71_v31 = vrot.slane %v70_v29, 2  ;;  %v100_v32 = vrot.slane %v99_v30, 1 }
  0x26   :  { %v72_v33 = vmax.f32 %v70_v29, %v71_v31  ;;  %v101_v34 = vadd.f32 %v100_v32, %v99_v30 }
  0x28   :  { %v73_v35 = vrot.slane %v72_v33, 1  ;;  %v104_v36 = vsub.f32 1.0, %v101_v34  ;;  %v112_v37 = vadd.f32 1.0, %v101_v34  ;;  %v102_v12 = vsub.f32 %v101_v34, %v324_v10 }
  0x2a   :  { %v74_v38 = vmax.f32 %v72_v33, %v73_v35  ;;  %248 = vrsqrt.f32 %v104_v36  ;;  %vm107_vm3 = vcmp.eq.f32.partialorder %v104_v36, inf  ;;  %v110_v44 = vand.u32 2147483648, %v104_v36 }
  0x2b   :  { %250 = vrsqrt.f32 %v112_v37  ;;  %vm109_vm4 = vcmp.eq.f32.partialorder %v104_v36, 0.0  ;;  %vm115_vm5 = vcmp.eq.f32.partialorder %v112_v37, inf  ;;  %v118_v47 = vand.u32 2147483648, %v112_v37 }
  0x2c   :  { %v75_v39 = vsub.f32 %v64_v20, %v74_v38  ;;  %v76_v40 = vsub.f32 %v65_v22, %v74_v38  ;;  %vm117_vm6 = vcmp.eq.f32.partialorder %v112_v37, 0.0  ;;  %v103_v19 = vmul.f32 %v102_v12, %v329_v15 }
  0x2e   :  { %v77_v41 = vmul.f32 1.442695, %v75_v39  ;;  %v79_v42 = vmul.f32 1.442695, %v76_v40 }
  0x30   :  { %252 = vpow2.f32 %v77_v41 }
  0x31   :  { %254 = vpow2.f32 %v79_v42 }
  0x34   :  { %v249_v43 = vpop.eup %248 }
  0x35   :  { %v251_v45 = vpop.eup %250  ;;  %v106_v46 = vmul.f32 %v249_v43, %v104_v36 }
  0x36   :  { %v114_v48 = vmul.f32 %v251_v45, %v112_v37 }
  0x37   :  { %v108_v49 = vsel %vm107_vm3, %v104_v36, %v106_v46 }
  0x38   :  { %v335_v50 = vsel %vm109_vm4, %v110_v44, %v108_v49  ;;  %v116_v51 = vsel %vm115_vm5, %v112_v37, %v114_v48 }
  0x39   :  { %v337_v52 = vsel %vm117_vm6, %v118_v47, %v116_v51  ;;  %v340_v53 = vand.u32 2147483647, %v335_v50  ;;  %vm155_vm12 = vcmp.ne.f32.partialorder %v335_v50, %v335_v50  ;;  %vm152_vm0 = vcmp.eq.f32.partialorder %v335_v50, 0.0 }
  0x3a   :  { %v253_v54 = vpop.eup %252  ;;  %v120_v55 = vand.u32 2147483647, %v337_v52  ;;  %vm150_vm10 = vcmp.lt.s32.totalorder %v337_v52, 0  ;;  %vm154_vm11 = vcmp.ne.f32.partialorder %v337_v52, %v337_v52  ;;  %vm147_vm13 = vcmp.lt.f32.partialorder %v337_v52, 0.0 }
  0x3b   :  { %v255_v56 = vpop.eup %254  ;;  %vm161_vm15 = vcmp.eq.s32.totalorder %v340_v53, inf  ;;  %v151_v36 = vsel %vm150_vm10, 3.1415927, %v287_v8  ;;  %vm156_vm1 = vmor %vm154_vm11, %vm155_vm12  ;;  %v165_v42 = vand.u32 2147483648, %v335_v50 }
  0x3c   :  { %v81_v57 = vsel %vm66_vm2, %v255_v56, 0.0  ;;  %v123_v58 = vmax.f32 %v120_v55, %v340_v53  ;;  %v122_v0 = vmin.f32 %v120_v55, %v340_v53  ;;  %vm144_vm9 = vcmp.gt.f32.partialorder %v340_v53, %v120_v55 }
  0x3d   :  { %v82_v59 = vadd.f32 %v253_v54, %v81_v57  ;;  %vm160_vm14 = vcmp.eq.s32.totalorder %v120_v55, inf }
  0x3e   :  { %256 = vrcp.f32 %v123_v58  ;;  %vm162_vm2 = vmand %vm160_vm14, %vm161_vm15 }
  0x3f   :  { %v83_v60 = vrot.slane %v82_v59, 4 }
  0x41   :  { %v84_v61 = vadd.f32 %v83_v60, %v82_v59 }
  0x43   :  { %v85_v62 = vrot.slane %v84_v61, 2 }
  0x45   :  { %v86_v63 = vadd.f32 %v85_v62, %v84_v61 }
  0x47   :  { %v87_v2 = vrot.slane %v86_v63, 1 }
  0x48   :  { %v257_v3 = vpop.eup %256 }
  0x49   :  { %v88_v4 = vadd.f32 %v87_v2, %v86_v63  ;;  %v125_v5 = vmul.f32 %v257_v3, %v122_v0 }
  0x4b   :  { %258 = vlog2.f32 %v88_v4  ;;  %v126_v6 = vmul.f32 %v125_v5, %v125_v5 }
  0x4d   :  { %v127_v7 = vmul.f32 0.002785687, %v126_v6 }
  0x4f   :  { %v128_v9 = vadd.f32 -0.015866, %v127_v7 }
  0x51   :  { %v129_v11 = vmul.f32 %v128_v9, %v126_v6 }
  0x53   :  { %v130_v13 = vadd.f32 0.04247222, %v129_v11 }
  0x55   :  { %v259_v14 = vpop.eup %258  ;;  %v131_v17 = vmul.f32 %v130_v13, %v126_v6 }
  0x56   :  { %v90_v18 = vmul.f32 0.6931472, %v259_v14 }
  0x57   :  { %v132_v20 = vadd.f32 -0.074975304, %v131_v17 }
  0x58   :  { %v91_v21 = vadd.f32 %v90_v18, %v74_v38  ;;  %v288_v38 = vmov 0.7853982  }
  0x59   :  { %v133_v22 = vmul.f32 %v132_v20, %v126_v6  ;;  %v159_v39 = vsel %vm147_vm13, 2.3561945, %v288_v38 }
  0x5a   :  { %v174_v23 = vsub.f32 %v91_v21, %v103_v19 }
  0x5b   :  { %v134_v24 = vadd.f32 0.1064488, %v133_v22 }
  0x5c   :  { %v175_v25 = vsel %vm173_vm7, %v174_v23, 0.0 }
  0x5d   :  { %v180_v26 = vsel %vm179_vm8, %v175_v25, 0.0  ;;  %v135_v10 = vmul.f32 %v134_v24, %v126_v6 }
  0x5e   :  { %181 = vadd.xlane.f32.xlu0 %v180_v26 }
  0x5f   :  { %v136_v27 = vadd.f32 -0.14207031, %v135_v10 }
  0x61   :  { %v137_v28 = vmul.f32 %v136_v27, %v126_v6 }
  0x63   :  { %v138_v1 = vadd.f32 0.19993454, %v137_v28 }
  0x65   :  { %v139_v29 = vmul.f32 %v138_v1, %v126_v6 }
  0x67   :  { %v140_v30 = vadd.f32 -0.33333147, %v139_v29 }
  0x69   :  { %v141_v31 = vmul.f32 %v140_v30, %v126_v6 }
  0x6b   :  { %v142_v15 = vmul.f32 %v141_v31, %v125_v5 }
  0x6d   :  { %v143_v32 = vadd.f32 %v142_v15, %v125_v5 }
  0x6f   :  { %v145_v33 = vsub.f32 1.5707964, %v143_v32 }
  0x71   :  { %v146_v34 = vsel %vm144_vm9, %v145_v33, %v143_v32 }
  0x72   :  { %v148_v35 = vsub.f32 3.1415927, %v146_v34 }
  0x74   :  { %v149_v37 = vsel %vm147_vm13, %v148_v35, %v146_v34 }
  0x75   :  { %v153_v40 = vsel %vm152_vm0, %v151_v36, %v149_v37 }
  0x76   :  { %v157_v41 = vsel %vm156_vm1, nan, %v153_v40 }
  0x77   :  { %v163_v43 = vsel %vm162_vm2, %v159_v39, %v157_v41 }
  0x78   :  { %v164_v44 = vand.u32 2147483647, %v163_v43 }
  0x7a   :  { %v166_v45 = vor.u32 %v165_v42, %v164_v44 }
  0x7c   :  { %v167_v46 = vmul.f32 2.0, %v166_v45 }
  0x7e   :  { %v176_v47 = vmul.f32 %v167_v46, %v167_v46 }
  0x80   :  { %v177_v48 = vsel %vm173_vm7, %v176_v47, 0.0 }
  0x81   :  { %v194_v8 = vsel %vm179_vm8, %v177_v48, 0.0 }
  0x82   :  { %195 = vadd.xlane.f32.xlu0 %v194_v8 }
  0xeb   :  { %v182_v49 = vpop.xlane.xlu0 %181 }
  0xec   :  { %v183_v51 = vrot.slane %v182_v49, 4 }
  0xee   :  { %v184_v52 = vadd.f32 %v183_v51, %v182_v49 }
  0xf0   :  { %v185_v53 = vrot.slane %v184_v52, 2 }
  0xf2   :  { %v186_v54 = vadd.f32 %v185_v53, %v184_v52 }
  0xf4   :  { %v187_v55 = vrot.slane %v186_v54, 1 }
  0xf6   :  { %v188_v56 = vadd.f32 %v187_v55, %v186_v54 }
  0xf8   :  { %240 = vpush %v188_v56 }
 0x10f   :  { %v196_v57 = vpop.xlane.xlu0 %195 }
 0x110   :  { %v197_v50 = vrot.slane %v196_v57, 4 }
 0x112   :  { %v198_v58 = vadd.f32 %v197_v50, %v196_v57 }
 0x114   :  { %v199_v59 = vrot.slane %v198_v58, 2 }
 0x116   :  { %v200_v60 = vadd.f32 %v199_v59, %v198_v58 }
 0x118   :  { %v201_v61 = vrot.slane %v200_v60, 1 }
 0x11a   :  { %v202_v62 = vadd.f32 %v201_v61, %v200_v60 }
 0x11c   :  { %242 = vpush %v202_v62 }
 0x129   :  { %s241_s0 = spop %240 }
 0x12a   :  { %s211_s25 = smul.f32 0.125, %s241_s0 }
 0x14d   :  { %s243_s1 = spop %242 }
 0x14e   :  { %s213_s24 = smul.f32 0.125, %s243_s1 }
 0x150   :  { %s214_s26 = smul.f32 0.55, %s213_s24 }
 0x152   :  { %s215_s27 = sadd.f32 %s214_s26, %s211_s25 }
 0x154   :  { %217 = sst [smem:[#allocation6]] %s215_s27 }
 0x155   :  { %281 = shalt.err (!%p278_p7)
}
 0x156   :  { %s289_s8 = smov [#allocation6]  }
 0x157   :  { %225 = dma.smem_to_hbm %s289_s8, 16, %s379_s3, [#allocation4]  }
 0x158   :  { %284 = dma.done.wait [#allocation4], 16  }
 0x159   :  { %285 = vsyncadd [#allocation4], 4294967280 }
 0x15a   :  { %229 = sfence }
 0x15b   :  { %230 = vsyncpa [#allocation4], 1 }
 0x15c   :  { %231 = vsyncpa [#allocation5], 1 }

</bundles_post_ra>
